<compile_context>
chip_gen: v5e
topology: v5e:2x2
jax: 0.10.0
libtpu: 0.0.40
codegen_flags: <defaults>
</compile_context>

<pallas_src>
import functools

import jax
import jax.numpy as jnp
from jax.experimental import pallas as pl
from jax.experimental.pallas import tpu as pltpu

_MiB = 1024 * 1024


def _vmem_capacity_bytes():
    try:
        return int(pltpu.get_tpu_info().vmem_capacity_bytes)
    except Exception:
        return 64 * _MiB            # conservative: v7x per-TensorCore VMEM


def _padded_bytes(shape, dtype):
    """VMEM bytes of one block after (sublane, lane) tile padding."""
    itemsize = jnp.dtype(dtype).itemsize
    sublane = 8 * max(1, 4 // itemsize)          # 8 f32 / 16 bf16 / 32 int8
    if len(shape) == 0:
        return 4
    if len(shape) == 1:
        rows, lanes, lead = 1, int(shape[0]), 1
    else:
        rows, lanes = int(shape[-2]), int(shape[-1])
        lead = 1
        for d in shape[:-2]:
            lead *= int(d)
    rows_p = -(-rows // sublane) * sublane
    lanes_p = -(-lanes // 128) * 128
    return lead * rows_p * lanes_p * itemsize


def _pick_block_rows(total, fits):
    """Largest row count that divides `total` and is a multiple of 8 (or the
    full extent, which is exempt from the (8,128) rule) and satisfies fits();
    if nothing fits the budget, the smallest legal candidate."""
    cands = [d for d in range(8, total, 8) if total % d == 0] + [total]
    fitting = [r for r in cands if fits(r)]
    return max(fitting) if fitting else min(cands)


def _finalize_mask_tv(s_tv, u, a, fold, fold_t, gamma, nv):
    """(n, t*v) abs-sum -> pre-scaled (n, t*v) f32 keep-mask."""
    s_v = jnp.dot(s_tv, fold, preferred_element_type=jnp.float32)      # (n, v)
    input_abs = s_v * (nv / jnp.sum(s_v))
    p = jnp.minimum(input_abs * gamma, 1.0)
    m_seed = (u < p).astype(jnp.float32)                               # Bernoulli(p)
    m = jnp.dot(m_seed, a, preferred_element_type=jnp.float32)
    mask = jnp.where(m > 0.001, 0.0, 1.0)                              # mask = 1 - M
    # Fold mask.numel()/mask.sum() renormalization into the mask itself.
    # (sum(mask) == 0 -> inf/nan, same as PyTorch.)
    mask = mask * (nv / jnp.sum(mask))
    return jnp.dot(mask, fold_t, preferred_element_type=jnp.float32)   # (n, t*v)


def _fused_kernel(gamma, nv, x_ref, u_ref, a_ref, fold_ref, fold_t_ref, o_ref):
    """Single pass: x in its lane-dense (n, c, t*v) view, fully VMEM resident,
    read from HBM exactly once; output store is lane-dense/unmasked."""
    x = x_ref[...]
    # Sum of |x| over c; the 1/(c*t) mean factor cancels in the normalization,
    # so (after the fold over t) this equals the chained torch.mean(mean()).
    s_tv = jnp.sum(jnp.abs(x).astype(jnp.float32), axis=1)             # (n, t*v)
    mask_tv = _finalize_mask_tv(s_tv, u_ref[...], a_ref[...],
                                fold_ref[...], fold_t_ref[...], gamma, nv)
    o_ref[...] = (x * mask_tv[:, None, :]).astype(o_ref.dtype)


def _reduce_mask_kernel(gamma, nv, x_ref, u_ref, a_ref, fold_ref, fold_t_ref,
                        mask_ref):
    """Two-pass path, pass 1: gridded lane-dense abs-sum + mask finalize.

    x_ref   : VMEM (n, cb, t*v)   one c-chunk of x viewed as (n, c, t*v)
    mask_ref: VMEM (n, t*v) f32   output; doubles as the accumulator across the
                                  grid, overwritten with the pre-scaled keep
                                  mask on the last grid step.
    """
    k = pl.program_id(0)

    @pl.when(k == 0)
    def _init():
        mask_ref[...] = jnp.zeros_like(mask_ref)

    mask_ref[...] += jnp.sum(jnp.abs(x_ref[...]).astype(jnp.float32), axis=1)

    @pl.when(k == pl.num_programs(0) - 1)
    def _finalize():
        mask_ref[...] = _finalize_mask_tv(
            mask_ref[...], u_ref[...], a_ref[...],
            fold_ref[...], fold_t_ref[...], gamma, nv)


def _apply_kernel(x_ref, mask_ref, o_ref):
    """Two-pass path, pass 2: lane-dense streaming masked scale.

    x_ref   : VMEM (1, cb, t*v)  block of x viewed as (n, c, t*v)
    mask_ref: VMEM (1, 1, t*v)   f32 pre-scaled mask row for this batch index
    o_ref   : VMEM (1, cb, t*v)
    """
    o_ref[...] = (x_ref[...] * mask_ref[...]).astype(o_ref.dtype)


def drop_block_ske(x, keep_prob, A, *, key=None, seed=0, training=True,
                   force_two_pass=False):
    """Pallas implementation of DropBlock_Ske.forward.

    x: (n, c, t, v), A: (v, v) adjacency, keep_prob: python float (same
    python-level `keep_prob == 1` early-out as the PyTorch module).
    Thread a fresh `key` per training step; the torch RNG stream itself is
    intentionally not reproduced.
    """
    if (not training) or keep_prob == 1:
        return x

    n, c, t, v = x.shape
    gamma = (1.0 - float(keep_prob)) / (1.0 + 1.92)
    nv = float(n * v)
    tv = t * v

    if key is None:
        key = jax.random.PRNGKey(seed)
    u = jax.random.uniform(key, (n, v), dtype=jnp.float32)
    A = A.astype(jnp.float32)
    # fold  (t*v, v): sums the t copies of each vertex    (s_tv @ fold -> s_v)
    # foldT (v, t*v): broadcasts a per-vertex value to t*v (mask @ foldT)
    fold = jnp.tile(jnp.eye(v, dtype=jnp.float32), (t, 1))
    fold_t = fold.T

    x3 = x.reshape(n, c, tv)          # lane-dense view used by every kernel

    cap = _vmem_capacity_bytes()
    if cap >= 96 * _MiB:              # v5e / v6e: 128 MiB VMEM, 1 TC per chip
        fused_gate = 80 * _MiB        # keep mid-size x on the 1-HBM-pass path
        block_budget = 8 * _MiB
    else:                             # v7x-class: 64 MiB per TC -> prefer the
        fused_gate = 12 * _MiB        # gridded 2-pass path (shards on 2 TCs)
        block_budget = 4 * _MiB

    small_bytes = (_padded_bytes((n, v), jnp.float32)        # u
                   + _padded_bytes((v, v), jnp.float32)      # A
                   + _padded_bytes((tv, v), jnp.float32)     # fold
                   + _padded_bytes((v, tv), jnp.float32)     # foldT
                   + _padded_bytes((n, tv), jnp.float32))    # s_tv / mask

    def vmem_limit(need):
        return int(min(max(need, 32 * _MiB), max(32 * _MiB, cap - 8 * _MiB)))

    # ---------- fused single-pass path (x read from HBM exactly once) -------
    x_blk = _padded_bytes((n, c, tv), x.dtype)
    x_f32 = _padded_bytes((n, c, tv), jnp.float32)
    fused_need = 2 * x_blk + 2 * x_f32 + small_bytes + 4 * _MiB
    if (not force_two_pass) and fused_need <= fused_gate:
        out3 = pl.pallas_call(
            functools.partial(_fused_kernel, gamma, nv),
            out_shape=jax.ShapeDtypeStruct((n, c, tv), x.dtype),
            in_specs=[pl.BlockSpec(memory_space=pltpu.MemorySpace.VMEM)] * 5,
            out_specs=pl.BlockSpec(memory_space=pltpu.MemorySpace.VMEM),
            compiler_params=pltpu.CompilerParams(
                vmem_limit_bytes=vmem_limit(fused_need)),
        )(x3, u, A, fold, fold_t)
        return out3.reshape(n, c, t, v)

    # ---------- two-pass path for large x ------------------------------------
    # Pass 1: pipelined lane-dense abs-sum over the c axis ("arbitrary"),
    # accumulated in the resident (n, t*v) output block, finalized (normalize,
    # Bernoulli, @A, threshold, renorm folded in, broadcast over t) on the
    # last grid step.
    cb = _pick_block_rows(
        c, lambda r: _padded_bytes((n, r, tv), x.dtype) <= 2 * block_budget)
    reduce_need = (2 * _padded_bytes((n, cb, tv), x.dtype)
                   + small_bytes + 4 * _MiB)
    mask_tv = pl.pallas_call(
        functools.partial(_reduce_mask_kernel, gamma, nv),
        out_shape=jax.ShapeDtypeStruct((n, tv), jnp.float32),
        grid=(c // cb,),
        in_specs=[
            pl.BlockSpec((n, cb, tv), lambda k: (0, k, 0)),
            pl.BlockSpec(memory_space=pltpu.MemorySpace.VMEM),   # u
            pl.BlockSpec(memory_space=pltpu.MemorySpace.VMEM),   # A
            pl.BlockSpec(memory_space=pltpu.MemorySpace.VMEM),   # fold
            pl.BlockSpec(memory_space=pltpu.MemorySpace.VMEM),   # foldT
        ],
        out_specs=pl.BlockSpec((n, tv), lambda k: (0, 0)),
        compiler_params=pltpu.CompilerParams(
            dimension_semantics=("arbitrary",),
            vmem_limit_bytes=vmem_limit(reduce_need)),
    )(x3, u, A, fold, fold_t)

    # Pass 2: lane-dense streaming multiply with large "parallel" blocks; the
    # f32 mask row is delivered through its own BlockSpec ((1, 1, t*v) block).
    mask3 = mask_tv.reshape(n, 1, tv)
    cb2 = _pick_block_rows(
        c, lambda r: _padded_bytes((1, r, tv), x.dtype) <= block_budget)
    apply_need = (4 * _padded_bytes((1, cb2, tv), x.dtype)
                  + 2 * _padded_bytes((1, 1, tv), jnp.float32) + 4 * _MiB)
    out3 = pl.pallas_call(
        _apply_kernel,
        out_shape=jax.ShapeDtypeStruct((n, c, tv), x.dtype),
        grid=(n, c // cb2),
        in_specs=[
            pl.BlockSpec((1, cb2, tv), lambda i, j: (i, j, 0)),
            pl.BlockSpec((1, 1, tv), lambda i, j: (i, 0, 0)),
        ],
        out_specs=pl.BlockSpec((1, cb2, tv), lambda i, j: (i, j, 0)),
        compiler_params=pltpu.CompilerParams(
            dimension_semantics=("parallel", "parallel"),
            vmem_limit_bytes=vmem_limit(apply_need)),
    )(x3, mask3)
    return out3.reshape(n, c, t, v)


def _reference(x, keep_prob, A, key):
    """Pure-JAX reference mirroring the PyTorch forward."""
    n, c, t, v = x.shape
    s = jnp.sum(jnp.abs(x).astype(jnp.float32), axis=(1, 2))    # (n, v)
    input_abs = s / jnp.sum(s) * (n * v)
    gamma = (1.0 - keep_prob) / (1.0 + 1.92)
    p = jnp.minimum(input_abs * gamma, 1.0)
    u = jax.random.uniform(key, (n, v), dtype=jnp.float32)
    m_seed = (u < p).astype(jnp.float32)
    m = m_seed @ A.astype(jnp.float32)
    mask = jnp.where(m > 0.001, 0.0, 1.0)
    return (x * mask[:, None, None, :] * (n * v) / jnp.sum(mask)).astype(x.dtype)


if __name__ == "__main__":
    # Small shapes consistent with the module (num_point = 11 vertices).
    n, c, t, v = 2, 4, 16, 11
    key = jax.random.PRNGKey(0)
    kx, ku = jax.random.split(key)
    x = jax.random.normal(kx, (n, c, t, v), dtype=jnp.float32)

    # Deterministic skeleton adjacency: self-loops + ring neighbors.
    eye = jnp.eye(v, dtype=jnp.float32)
    A = eye + jnp.roll(eye, 1, axis=1) + jnp.roll(eye, -1, axis=1)

    keep_prob = 0.9
    out_fused = jax.block_until_ready(
        drop_block_ske(x, keep_prob, A, key=ku, training=True))
    out_2pass = jax.block_until_ready(
        drop_block_ske(x, keep_prob, A, key=ku, training=True,
                       force_two_pass=True))
    ref = _reference(x, keep_prob, A, ku)

    assert out_fused.shape == x.shape and out_fused.dtype == x.dtype
    assert bool(jnp.all(jnp.isfinite(out_fused)))
    assert bool(jnp.allclose(out_fused, ref, rtol=1e-5, atol=1e-5))
    assert bool(jnp.allclose(out_2pass, ref, rtol=1e-5, atol=1e-5))
    print("KERNEL_OK")
</pallas_src>

<mosaic_0001>
module attributes {stable_mosaic.version = 11 : i64} {
  func.func @_fused_kernel(%arg0: memref<2x4x176xf32, #tpu.memory_space<vmem>>, %arg1: memref<2x11xf32, #tpu.memory_space<vmem>>, %arg2: memref<11x11xf32, #tpu.memory_space<vmem>>, %arg3: memref<176x11xf32, #tpu.memory_space<vmem>>, %arg4: memref<11x176xf32, #tpu.memory_space<vmem>>, %arg5: memref<2x4x176xf32, #tpu.memory_space<vmem>>) attributes {dimension_semantics = [], scalar_prefetch = 0 : i64, scratch_operands = 0 : i64, tpu.core_type = #tpu.core_type<tc>} {
    %c0 = arith.constant 0 : index
    %c0_0 = arith.constant 0 : index
    %c0_1 = arith.constant 0 : index
    %0 = vector.load %arg0[%c0, %c0_0, %c0_1] : memref<2x4x176xf32, #tpu.memory_space<vmem>>, vector<2x4x176xf32>
    %1 = math.absf %0 : vector<2x4x176xf32>
    %cst = arith.constant dense<0.000000e+00> : vector<2x176xf32>
    %2 = vector.multi_reduction <add>, %1, %cst [1] : vector<2x4x176xf32> to vector<2x176xf32>
    %c0_2 = arith.constant 0 : index
    %c0_3 = arith.constant 0 : index
    %3 = vector.load %arg1[%c0_2, %c0_3] : memref<2x11xf32, #tpu.memory_space<vmem>>, vector<2x11xf32>
    %c0_4 = arith.constant 0 : index
    %c0_5 = arith.constant 0 : index
    %4 = vector.load %arg2[%c0_4, %c0_5] : memref<11x11xf32, #tpu.memory_space<vmem>>, vector<11x11xf32>
    %c0_6 = arith.constant 0 : index
    %c0_7 = arith.constant 0 : index
    %5 = vector.load %arg3[%c0_6, %c0_7] : memref<176x11xf32, #tpu.memory_space<vmem>>, vector<176x11xf32>
    %c0_8 = arith.constant 0 : index
    %c0_9 = arith.constant 0 : index
    %6 = vector.load %arg4[%c0_8, %c0_9] : memref<11x176xf32, #tpu.memory_space<vmem>>, vector<11x176xf32>
    %cst_10 = arith.constant dense<0.000000e+00> : vector<2x11xf32>
    %7 = tpu.matmul %2, %5, %cst_10 {dimension_numbers = #tpu.dot_dimension_numbers<[1], [0], [0], [1], [0, 0, 1, 1], [], []>} : vector<2x176xf32>, vector<176x11xf32>, vector<2x11xf32> -> vector<2x11xf32>
    %8 = vector.shape_cast %7 : vector<2x11xf32> to vector<1x2x11xf32>
    %cst_11 = arith.constant dense<0.000000e+00> : vector<1xf32>
    %9 = vector.multi_reduction <add>, %8, %cst_11 [1, 2] : vector<1x2x11xf32> to vector<1xf32>
    %10 = vector.shape_cast %9 : vector<1xf32> to vector<1x1x1xf32>
    %11 = vector.extract %10[0, 0, 0] : f32 from vector<1x1x1xf32>
    %cst_12 = arith.constant 2.200000e+01 : f32
    %12 = arith.divf %cst_12, %11 : f32
    %13 = vector.broadcast %12 : f32 to vector<2x11xf32>
    %14 = arith.mulf %7, %13 : vector<2x11xf32>
    %cst_13 = arith.constant 0.0342465751 : f32
    %15 = vector.broadcast %cst_13 : f32 to vector<2x11xf32>
    %16 = arith.mulf %14, %15 : vector<2x11xf32>
    %cst_14 = arith.constant 1.000000e+00 : f32
    %17 = vector.broadcast %cst_14 : f32 to vector<2x11xf32>
    %18 = arith.minimumf %16, %17 : vector<2x11xf32>
    %19 = arith.cmpf olt, %3, %18 : vector<2x11xf32>
    %20 = arith.extui %19 : vector<2x11xi1> to vector<2x11xi32>
    %21 = arith.sitofp %20 : vector<2x11xi32> to vector<2x11xf32>
    %cst_15 = arith.constant dense<0.000000e+00> : vector<2x11xf32>
    %22 = tpu.matmul %21, %4, %cst_15 {dimension_numbers = #tpu.dot_dimension_numbers<[1], [0], [0], [1], [0, 0, 1, 1], [], []>} : vector<2x11xf32>, vector<11x11xf32>, vector<2x11xf32> -> vector<2x11xf32>
    %cst_16 = arith.constant 1.000000e-03 : f32
    %23 = vector.broadcast %cst_16 : f32 to vector<2x11xf32>
    %24 = arith.cmpf ogt, %22, %23 : vector<2x11xf32>
    %cst_17 = arith.constant 0.000000e+00 : f32
    %cst_18 = arith.constant 1.000000e+00 : f32
    %25 = vector.broadcast %cst_17 : f32 to vector<2x11xf32>
    %26 = vector.broadcast %cst_18 : f32 to vector<2x11xf32>
    %27 = arith.select %24, %25, %26 : vector<2x11xi1>, vector<2x11xf32>
    %28 = vector.shape_cast %27 : vector<2x11xf32> to vector<1x2x11xf32>
    %cst_19 = arith.constant dense<0.000000e+00> : vector<1xf32>
    %29 = vector.multi_reduction <add>, %28, %cst_19 [1, 2] : vector<1x2x11xf32> to vector<1xf32>
    %30 = vector.shape_cast %29 : vector<1xf32> to vector<1x1x1xf32>
    %31 = vector.extract %30[0, 0, 0] : f32 from vector<1x1x1xf32>
    %cst_20 = arith.constant 2.200000e+01 : f32
    %32 = arith.divf %cst_20, %31 : f32
    %33 = vector.broadcast %32 : f32 to vector<2x11xf32>
    %34 = arith.mulf %27, %33 : vector<2x11xf32>
    %cst_21 = arith.constant dense<0.000000e+00> : vector<2x176xf32>
    %35 = tpu.matmul %34, %6, %cst_21 {dimension_numbers = #tpu.dot_dimension_numbers<[1], [0], [0], [1], [0, 0, 1, 1], [], []>} : vector<2x11xf32>, vector<11x176xf32>, vector<2x176xf32> -> vector<2x176xf32>
    %36 = vector.shape_cast %35 : vector<2x176xf32> to vector<2x1x176xf32>
    %37 = vector.broadcast %36 : vector<2x1x176xf32> to vector<2x4x176xf32>
    %38 = arith.mulf %0, %37 : vector<2x4x176xf32>
    %c0_22 = arith.constant 0 : index
    %c0_23 = arith.constant 0 : index
    %c0_24 = arith.constant 0 : index
    %39 = vector.load %arg5[%c0_22, %c0_23, %c0_24] : memref<2x4x176xf32, #tpu.memory_space<vmem>>, vector<2x4x176xf32>
    tpu.vector_store %arg5[%c0_22, %c0_23, %c0_24], %38 {strides = array<i32>} : memref<2x4x176xf32, #tpu.memory_space<vmem>>, vector<2x4x176xf32>,
    return
  }
}

</mosaic_0001>

<bundles_post_ra>
// kernel: tpu_custom_call.1
= control target key start
LH: loop header
LB: loop body
LE: loop exit
PB: predicated region body
PF: predicated region fallthrough
CT: control target
= control target key end

     0   :  { %s540_s0 = inlined_call_operand.vmem [shape: f32[2,4,176], index: 0, kind: input, shape index: {}]   ;;  %s541_s1 = inlined_call_operand.vmem [shape: f32[2,11], index: 1, kind: input, shape index: {}]   ;;  %s542_s2 = inlined_call_operand.vmem [shape: f32[11,11], index: 2, kind: input, shape index: {}]   ;;  %s543_s3 = inlined_call_operand.vmem [shape: f32[176,11], index: 3, kind: input, shape index: {}]   ;;  %s544_s4 = inlined_call_operand.vmem [shape: f32[11,176], index: 4, kind: input, shape index: {}]   ;;  %s545_s5 = inlined_call_operand.hbm [shape: f32[2,4,176], index: 5, kind: output, shape index: {}]  }
   0x1   :  { %v86_v0 = vld [vmem:[%s543_s3 + $0x78] sm:$0xff]  ;;  %v85_v1 = vld [vmem:[%s543_s3 + $0x70] sm:$0xff]  ;;  %v84_v2 = vld [vmem:[%s543_s3 + $0x68] sm:$0xff] }
   0x2   :  { %108 = vmatpush.msra.mxu0 %v86_v0  ;;  %v92_v3 = vld [vmem:[%s543_s3 + $0xa8] sm:$0xff]  ;;  %v83_v4 = vld [vmem:[%s543_s3 + $0x60] sm:$0xff]  ;;  %v90_v6 = vld [vmem:[%s543_s3 + $0x98] sm:$0xff] }
   0x3   :  { %138 = vmatpush.msra.mxu1 %v92_v3  ;;  %v91_v5 = vld [vmem:[%s543_s3 + $0xa0] sm:$0xff]  ;;  %v82_v7 = vld [vmem:[%s543_s3 + $0x58] sm:$0xff]  ;;  %v81_v8 = vld [vmem:[%s543_s3 + $0x50] sm:$0xff] }
   0x4   :  { %109 = vmatpush.msra.mxu0 %v85_v1  ;;  %v89_v9 = vld [vmem:[%s543_s3 + $0x90] sm:$0xff]  ;;  %v451_v10 = vld [vmem:[%s540_s0] sm:$0xff]  ;;  %v456_v11 = vld [vmem:[%s540_s0 + $0x8] sm:$0xff] }
   0x5   :  { %139 = vmatpush.msra.mxu1 %v91_v5  ;;  %v23_v12 = vand.u32 2147483647, %v451_v10  ;;  %v24_v13 = vand.u32 2147483647, %v456_v11 }
   0x6   :  { %110 = vmatpush.msra.mxu0 %v84_v2 }
   0x7   :  { %140 = vmatpush.msra.mxu1 %v90_v6 }
   0x8   :  { %111 = vmatpush.msra.mxu0 %v83_v4 }
   0x9   :  { %10 = vsyncpa [#allocation3], 0  ;;  %v88_v14 = vld [vmem:[%s543_s3 + $0x88] sm:$0xff]  ;;  %141 = vmatpush.msra.mxu1 %v89_v9  ;;  %27 = vst [vmem:[#allocation1] ss:$2 sm:$0xff] %v23_v12  ;;  %v87_v16 = vld [vmem:[%s543_s3 + $0x80] sm:$0xff] }
   0xa   :  { %112 = vmatpush.msra.mxu0 %v82_v7  ;;  %v80_v15 = vld [vmem:[%s543_s3 + $0x48] sm:$0xff]  ;;  %31 = vst [vmem:[#allocation1 + $0x10] ss:$2 sm:$0xff] %v24_v13  ;;  %v79_v17 = vld [vmem:[%s543_s3 + $0x40] sm:$0xff]  ;;  %v78_v18 = vld [vmem:[%s543_s3 + $0x38] sm:$0xff]  ;;  %vm38_vm0 = vcmask 1043456  }
   0xb   :  { %142 = vmatpush.msra.mxu1 %v88_v14  ;;  %vm46_vm1 = vcmask 388096   ;;  %v77_v19 = vld [vmem:[%s543_s3 + $0x30] sm:$0xff]  ;;  %v76_v22 = vld [vmem:[%s543_s3 + $0x28] sm:$0xff]  ;;  %v75_v30 = vld [vmem:[%s543_s3 + $0x20] sm:$0xff]  ;;  %vm101_vm2 = vcmask 1041409   ;;  %vm105_vm3 = vcmask 392192  }
   0xc   :  { %113 = vmatpush.msra.mxu0 %v81_v8  ;;  %v74_v36 = vld [vmem:[%s543_s3 + $0x18] sm:$0xff]  ;;  %v73_v41 = vld [vmem:[%s543_s3 + $0x10] sm:$0xff]  ;;  %v72_v46 = vld [vmem:[%s543_s3 + $0x8] sm:$0xff]  ;;  %vm148_vm4 = vcmask 82944   ;;  %vm187_vm9 = vcmask 1042432   ;;  %vm183_vm10 = vcmask 89088  }
   0xd   :  { %143 = vmatpush.msra.mxu1 %v87_v16  ;;  %v71_v51 = vld [vmem:[%s543_s3] sm:$0xff]  ;;  %s320_s9 = sshll.u32 %s545_s5, 4  ;;  %s386_s10 = smov 128   ;;  %s321_s9 = int_to_ptr.hbm [resolvable:$true] %s320_s9 }
   0xe   :  { %114 = vmatpush.msra.mxu0 %v80_v15  ;;  %s387_s11 = smov 8  }
  0x10   :  { %115 = vmatpush.msra.mxu0 %v79_v17  ;;  %v28_v20 = vld.sshfl [vmem:[#allocation1] sm:$0xff pattern:$0x75316420]  ;;  %v29_v21 = vld.sshfl [vmem:[#allocation1 + $0x8] sm:$0xff pattern:$0x75316420] }
  0x11   :  { %v32_v23 = vld.sshfl [vmem:[#allocation1 + $0x10] sm:$0xff pattern:$0x75316420]  ;;  %v39_v24 = vsel %vm38_vm0, %v28_v20, 0.0  ;;  %v47_v25 = vsel %vm46_vm1, %v29_v21, 0.0  ;;  %v69_v21 = vld [vmem:[%s542_s2] sm:$0xff] }
  0x12   :  { %116 = vmatpush.msra.mxu0 %v78_v18  ;;  %v40_v26 = vrot.slane %v39_v24, 4  ;;  %v54_v27 = vsel %vm38_vm0, %v32_v23, 0.0  ;;  %v33_v28 = vld.sshfl [vmem:[#allocation1 + $0x18] sm:$0xff pattern:$0x75316420]  ;;  %v48_v29 = vrot.slane %v47_v25, 4 }
  0x13   :  { %v55_v31 = vrot.slane %v54_v27, 4  ;;  %v61_v32 = vsel %vm46_vm1, %v33_v28, 0.0  ;;  %v70_v20 = vld [vmem:[%s542_s2 + $0x8] sm:$0x7] }
  0x14   :  { %117 = vmatpush.msra.mxu0 %v77_v19  ;;  %v41_v33 = vadd.f32 %v40_v26, %v39_v24  ;;  %v49_v34 = vadd.f32 %v48_v29, %v47_v25  ;;  %v62_v35 = vrot.slane %v61_v32, 4  ;;  %334 = vmatpush.msk.msra.mxu2 %vm187_vm9, %v70_v20  ;;  %v68_v25 = vld [vmem:[%s541_s1] sm:$0x3] }
  0x15   :  { %v56_v37 = vadd.f32 %v55_v31, %v54_v27  ;;  %v383_v27 = vmov 0.0  }
  0x16   :  { %118 = vmatpush.msra.mxu0 %v76_v22  ;;  %v42_v38 = vrot.slane %v41_v33, 2  ;;  %v50_v39 = vrot.slane %v49_v34, 2  ;;  %v63_v40 = vadd.f32 %v62_v35, %v61_v32  ;;  %206 = vmatpush.msra.mxu2 %v69_v21 }
  0x17   :  { %v57_v42 = vrot.slane %v56_v37, 2 }
  0x18   :  { %119 = vmatpush.msra.mxu0 %v75_v30  ;;  %v43_v43 = vadd.f32 %v42_v38, %v41_v33  ;;  %v51_v44 = vadd.f32 %v50_v39, %v49_v34  ;;  %v64_v45 = vrot.slane %v63_v40, 2  ;;  %v384_v30 = vmov 1.0  }
  0x19   :  { %v58_v47 = vadd.f32 %v57_v42, %v56_v37 }
  0x1a   :  { %120 = vmatpush.msra.mxu0 %v74_v36  ;;  %v44_v48 = vrot.slane %v43_v43, 1  ;;  %v52_v49 = vrot.slane %v51_v44, 1  ;;  %v65_v50 = vadd.f32 %v64_v45, %v63_v40  ;;  %v96_v40 = vld [vmem:[%s544_s4 + $0x18] sm:$0x7] }
  0x1b   :  { %v59_v52 = vrot.slane %v58_v47, 1  ;;  %338 = vmatpush.msk.msrb.mxu2 %vm187_vm9, %v96_v40 }
  0x1c   :  { %121 = vmatpush.msra.mxu0 %v73_v41  ;;  %v45_v53 = vadd.f32 %v44_v48, %v43_v43  ;;  %v53_v54 = vadd.f32 %v52_v49, %v51_v44  ;;  %v66_v55 = vrot.slane %v65_v50, 1 }
  0x1d   :  { %v60_v56 = vadd.f32 %v59_v52, %v58_v47  ;;  %v95_v52 = vld [vmem:[%s544_s4 + $0x10] sm:$0x7] }
  0x1e   :  { %122 = vmatpush.msra.mxu0 %v72_v46  ;;  %v67_v57 = vadd.f32 %v66_v55, %v65_v50  ;;  %336 = vmatpush.msk.msra.mxu3 %vm187_vm9, %v95_v52 }
  0x1f   :  { %v102_v58 = vsel %vm101_vm2, %v60_v56, %v45_v53  ;;  %v94_v53 = vld [vmem:[%s544_s4 + $0x8] sm:$0xff] }
  0x20   :  { %123 = vmatpush.msra.mxu0 %v71_v51  ;;  %v103_v59 = vsel %vm101_vm2, %v67_v57, %v53_v54  ;;  %v93_v54 = vld [vmem:[%s544_s4] sm:$0xff]  ;;  %286 = vmatpush.msrb.mxu2 %v94_v53  ;;  %s385_s4 = smov [#allocation2]  }
  0x21   :  { %124 = vmatmul.f32.vlgmr.msra.gmra.mxu0 %v102_v58  ;;  %332 = vmatmul.msk.f32.vlgmr.msra.gmra.mxu1 %vm105_vm3, %v103_v59  ;;  %vm294_vm3 = vcmask 1040384   ;;  %s318_s6 = sshll.u32 %s385_s4, 4  ;;  %s319_s6 = int_to_ptr.vmem [resolvable:$true] %s318_s6 }
  0x22   :  { %266 = vmatpush.msra.mxu3 %v93_v54 }
  0x9e   :  { %v125_v60 = vpop.f32.mrf.mxu0  ;;  %v145_v61 = vpop.f32.mrf.mxu1 }
  0x9f   :  { %v146_v62 = vadd.f32 %v145_v61, %v125_v60 }
  0xa1   :  { %v149_v63 = vsel %vm148_vm4, %v146_v62, 0.0 }
  0xa2   :  { %150 = vadd.xlane.f32.xlu0 %v149_v63 }
 0x115   :  { %v151_v0 = vpop.xlane.xlu0 %150 }
 0x116   :  { %v152_v1 = vrot.slane %v151_v0, 4 }
 0x118   :  { %v153_v2 = vadd.f32 %v152_v1, %v151_v0 }
 0x11a   :  { %v154_v3 = vrot.slane %v153_v2, 2 }
 0x11c   :  { %v155_v4 = vadd.f32 %v154_v3, %v153_v2 }
 0x11e   :  { %v156_v5 = vrot.slane %v155_v4, 1 }
 0x120   :  { %v157_v6 = vadd.f32 %v156_v5, %v155_v4 }
 0x122   :  { %340 = vpush %v157_v6 }
 0x153   :  { %s341_s3 = spop %340 }
 0x154   :  { %v159_v7 = vstv %s341_s3 }
 0x155   :  { %353 = vrcp.f32 %v159_v7  ;;  %v171_v13 = vand.u32 2147483648, %v159_v7  ;;  %v169_v15 = vand.u32 2147483647, %v159_v7  ;;  %vm165_vm6 = vweird.f32 %v159_v7 }
 0x157   :  { %v172_v17 = vor.u32 1.1754944e-38, %v171_v13  ;;  %vm170_vm8 = vcmp.eq.f32.partialorder %v169_v15, 8.507059e+37 }
 0x15b   :  { %v354_v8 = vpop.eup %353 }
 0x15c   :  { %v161_v9 = vmul.f32 %v354_v8, %v159_v7  ;;  %vm166_vm5 = vweird.f32 %v354_v8 }
 0x15d   :  { %vm167_vm7 = vmor %vm165_vm6, %vm166_vm5 }
 0x15e   :  { %v162_v12 = vsub.f32 1.0, %v161_v9 }
 0x160   :  { %v163_v14 = vmul.f32 %v354_v8, %v162_v12 }
 0x162   :  { %v164_v16 = vadd.f32 %v354_v8, %v163_v14 }
 0x164   :  { %v168_v18 = vsel %vm167_vm7, %v354_v8, %v164_v16 }
 0x165   :  { %v173_v19 = vsel %vm170_vm8, %v172_v17, %v168_v18 }
 0x166   :  { %342 = vpush %v173_v19 }
 0x197   :  { %s343_s19 = spop %342 }
 0x198   :  { %s175_s20 = smul.f32 22.0, %s343_s19 }
 0x19a   :  { %v176_v22 = vstv %s175_s20 }
 0x19b   :  { %v177_v23 = vmul.f32 %v176_v22, %v146_v62 }
 0x19d   :  { %v178_v24 = vmul.f32 0.034246575, %v177_v23 }
 0x19f   :  { %v179_v26 = vmin.f32 %v178_v24, 1.0 }
 0x1a1   :  { %vm180_vm11 = vcmp.lt.f32.partialorder %v68_v25, %v179_v26 }
 0x1a2   :  { %v333_v28 = vsel %vm180_vm11, 1.0, %v383_v27 }
 0x1a3   :  { %335 = vmatmul.msk.f32.vlgmr.msra.gmra.mxu2 %vm183_vm10, %v333_v28 }
 0x226   :  { %v208_v29 = vpop.f32.mrf.mxu2 }
 0x227   :  { %vm211_vm12 = vcmp.gt.f32.partialorder %v208_v29, 0.001 }
 0x228   :  { %v212_v31 = vsel %vm211_vm12, 0.0, %v384_v30 }
 0x229   :  { %v213_v32 = vsel %vm148_vm4, %v212_v31, 0.0  ;;  %vm310_vm4 = vcmask 392196  }
 0x22a   :  { %214 = vadd.xlane.f32.xlu0 %v213_v32  ;;  %vm311_vm5 = vmor %vm310_vm4, %vm38_vm0 }
 0x29d   :  { %v215_v33 = vpop.xlane.xlu0 %214 }
 0x29e   :  { %v216_v34 = vrot.slane %v215_v33, 4 }
 0x2a0   :  { %v217_v35 = vadd.f32 %v216_v34, %v215_v33 }
 0x2a2   :  { %v218_v36 = vrot.slane %v217_v35, 2 }
 0x2a4   :  { %v219_v37 = vadd.f32 %v218_v36, %v217_v35 }
 0x2a6   :  { %v220_v38 = vrot.slane %v219_v37, 1 }
 0x2a8   :  { %v221_v39 = vadd.f32 %v220_v38, %v219_v37 }
 0x2aa   :  { %344 = vpush %v221_v39 }
 0x2db   :  { %s345_s22 = spop %344 }
 0x2dc   :  { %v223_v41 = vstv %s345_s22 }
 0x2dd   :  { %355 = vrcp.f32 %v223_v41  ;;  %v235_v45 = vand.u32 2147483648, %v223_v41  ;;  %v233_v47 = vand.u32 2147483647, %v223_v41  ;;  %vm229_vm14 = vweird.f32 %v223_v41 }
 0x2df   :  { %v236_v49 = vor.u32 1.1754944e-38, %v235_v45  ;;  %vm234_vm1 = vcmp.eq.f32.partialorder %v233_v47, 8.507059e+37 }
 0x2e3   :  { %v356_v42 = vpop.eup %355 }
 0x2e4   :  { %v225_v43 = vmul.f32 %v356_v42, %v223_v41  ;;  %vm230_vm13 = vweird.f32 %v356_v42 }
 0x2e5   :  { %vm231_vm15 = vmor %vm229_vm14, %vm230_vm13 }
 0x2e6   :  { %v226_v44 = vsub.f32 1.0, %v225_v43 }
 0x2e8   :  { %v227_v46 = vmul.f32 %v356_v42, %v226_v44 }
 0x2ea   :  { %v228_v48 = vadd.f32 %v356_v42, %v227_v46 }
 0x2ec   :  { %v232_v50 = vsel %vm231_vm15, %v356_v42, %v228_v48 }
 0x2ed   :  { %v237_v51 = vsel %vm234_vm1, %v236_v49, %v232_v50 }
 0x2ee   :  { %346 = vpush %v237_v51 }
 0x31f   :  { %s347_s29 = spop %346 }
 0x320   :  { %s239_s30 = smul.f32 22.0, %s347_s29 }
 0x322   :  { %v240_v55 = vstv %s239_s30 }
 0x323   :  { %v241_v56 = vmul.f32 %v240_v55, %v212_v31 }
 0x325   :  { %337 = vmatmul.msk.f32.vlgmr.msra.gmra.mxu3 %vm183_vm10, %v241_v56  ;;  %339 = vmatmul.msk.f32.vlgmr.msrb.gmra.mxu2 %vm183_vm10, %v241_v56 }
 0x3a8   :  { %v288_v57 = vpop.f32.mrf.mxu2  ;;  %v268_v59 = vpop.f32.mrf.mxu3 }
 0x3a9   :  { %v293_v58 = vrot.slane %v288_v57, 7 }
 0x3ab   :  { %v295_v60 = vsel %vm294_vm3, %v268_v59, %v293_v58  ;;  %v296_v61 = vsel %vm101_vm2, %v268_v59, %v293_v58 }
 0x3ac   :  { %v297_v62 = vrot.slane %v296_v61, 1  ;;  %v299_v63 = vperm.slane %v295_v60, 1  ;;  %v298_v0 = vperm.slane %v295_v60, 0 }
 0x3ae   :  { %v301_v1 = vperm.slane %v297_v62, 1  ;;  %v302_v2 = vrot.slane %v299_v63, 4  ;;  %v300_v3 = vperm.slane %v297_v62, 0 }
 0x3b0   :  { %v303_v4 = vrot.slane %v301_v1, 4  ;;  %v304_v5 = vsel %vm38_vm0, %v298_v0, %v302_v2 }
 0x3b1   :  { %v308_v6 = vmul.f32 %v304_v5, %v451_v10 }
 0x3b2   :  { %v305_v7 = vsel %vm38_vm0, %v300_v3, %v303_v4 }
 0x3b3   :  { %v309_v8 = vmul.f32 %v305_v7, %v456_v11  ;;  %312 = vst.msk [vmem:[#allocation2] sm:$0xff] %vm311_vm5, %v308_v6 }
 0x3b5   :  { %313 = vst.msk [vmem:[#allocation2 + $0x8] sm:$0xff] %vm311_vm5, %v309_v8 }
 0x3b6   :  { %326 = dma.vmem_to_hbm [thread:$0]  %s319_s6, 256, %s321_s9, [#allocation3], %s386_s10, %s386_s10, %s387_s11  }
 0x3b7   :  { %381 = dma.done.wait [#allocation3], 256  }
 0x3b8   :  { %382 = vsyncadd [#allocation3], 4294967040 }
 0x3b9   :  { %331 = vsyncpa [#allocation3], 1 }

</bundles_post_ra>
